<compile_context>
chip_gen: v7x
topology: tpu7x:2x2x1
jax: 0.10.0
libtpu: 0.0.40
codegen_flags: <defaults>
</compile_context>

<pallas_src>
import math
from functools import partial

import jax
import jax.numpy as jnp
from jax import lax
from jax.experimental import pallas as pl
from jax.experimental.pallas import tpu as pltpu

ROOT_2 = math.sqrt(2.0)
LOG_ROOT_2 = math.log(ROOT_2)
LANES = 128
SUBLANES = 8
MAX_BLOCK_ROWS = 2048        # 2048x128 f32 = 1 MiB per stream-half per buffer
STD_EPS = 1e-3


def _softplus(x):
    """Numerically stable softplus, same formula in kernel and reference."""
    x = x.astype(jnp.float32)
    return jnp.maximum(x, 0.0) + jnp.log(1.0 + jnp.exp(-jnp.abs(x)))


# TODO(synk): get_mean_std is a user-supplied callable in the original module;
# it is realized deterministically here: logits carries 2*C channels (NCHW),
# the first C are the means, softplus of the last C (+eps) is the std.
def get_mean_std(logits, num_target_channels):
    c = num_target_channels
    return logits[:, :c], _softplus(logits[:, c:]) + STD_EPS


def _laplace_sum_kernel(logits_ref, targets_ref, out_ref, acc_ref, *,
                        block_rows, valid_in_last, needs_mask, clips):
    """Accumulate sum of sqrt(2)*|mu - t|/std + log(std) for one (batch, split)."""
    j = pl.program_id(2)

    @pl.when(j == 0)
    def _init():
        acc_ref[...] = jnp.zeros_like(acc_ref)

    means = logits_ref[0, 0].astype(jnp.float32)        # (block_rows, 128)
    std_logit = logits_ref[0, 1].astype(jnp.float32)    # (block_rows, 128)
    tgt = targets_ref[0].astype(jnp.float32)            # (block_rows, 128)

    # softplus(+eps) fused in-kernel (exp/log ride the EUP slot).
    std = (jnp.maximum(std_logit, 0.0)
           + jnp.log(1.0 + jnp.exp(-jnp.abs(std_logit)))
           + jnp.float32(STD_EPS))

    delta = jnp.abs(means - tgt)
    if clips is not None:
        delta = jnp.minimum(delta, jnp.float32(clips[0]))   # delta[delta > c0] = c0
        std = jnp.maximum(std, jnp.float32(clips[1]))        # std[std < c1] = c1

    # log(sqrt(2)) is folded into the wrapper.  Exact divide keeps bit-parity
    # with the reference; pl.reciprocal(std, approx=True) is the option if the
    # kernel ever becomes EUP-bound and the tolerance allows.
    lap = jnp.float32(ROOT_2) * delta / std + jnp.log(std)

    if needs_mask:
        # Only the global last row-block can hold invalid (padded / beyond-end)
        # elements; every other block uses the full-block threshold.
        is_last = jnp.logical_and(pl.program_id(1) == pl.num_programs(1) - 1,
                                  j == pl.num_programs(2) - 1)
        limit = jnp.where(is_last, jnp.int32(valid_in_last),
                          jnp.int32(block_rows * LANES))
        local_idx = (
            lax.broadcasted_iota(jnp.int32, (block_rows, LANES), 0) * LANES
            + lax.broadcasted_iota(jnp.int32, (block_rows, LANES), 1))
        lap = jnp.where(local_idx < limit, lap, 0.0)

    # Layout-preserving fold: each (8,128) slab is one vreg, so this is pure
    # inter-vreg VALU adds into a single-vreg accumulator.
    acc_ref[...] += lap.reshape(block_rows // SUBLANES, SUBLANES, LANES).sum(axis=0)

    @pl.when(j == pl.num_programs(2) - 1)
    def _finalize():
        out_ref[...] = acc_ref[...]


def laplace_loss(logits, targets, clips=None):
    """LaplaceLoss.forward: mean of sqrt(2)*|mu - t|/std + log(sqrt(2)*std)."""
    n, c = targets.shape[0], targets.shape[1]
    assert logits.shape[0] == n and logits.shape[1] == 2 * c

    total = targets.size
    per_batch = total // n

    if per_batch % (LANES * SUBLANES) == 0:
        # Fast path: zero-copy views.  logits (N,2C,H,W) -> (N, 2, rows, 128)
        # (means half / std-logit half); targets (N,C,H,W) -> (N, rows, 128).
        rows = per_batch // LANES
        logits_v = logits.reshape(n, 2, rows, LANES)
        targets_v = targets.reshape(n, rows, LANES)
    else:
        # Misaligned fallback: keep the batch axis, single pad per stream.
        rows = -(-per_batch // LANES)
        rows += (-rows) % SUBLANES
        pad = rows * LANES - per_batch
        logits_v = jnp.pad(logits.reshape(n, 2, per_batch),
                           ((0, 0), (0, 0), (0, pad))).reshape(n, 2, rows, LANES)
        targets_v = jnp.pad(targets.reshape(n, per_batch),
                            ((0, 0), (0, pad))).reshape(n, rows, LANES)

    block_rows = min(rows, MAX_BLOCK_ROWS)
    if n == 1 and block_rows == rows and rows % (2 * SUBLANES) == 0:
        # Single image: halve the block so the row axis can feed both v7x
        # TensorCores (harmless on single-TC v5e/v6e).
        block_rows = rows // 2
    num_j_total = -(-rows // block_rows)
    n_split = 2 if (n == 1 and num_j_total % 2 == 0) else 1
    njs = num_j_total // n_split

    capacity = num_j_total * block_rows * LANES            # elements scanned / batch
    valid_in_last = per_batch - (num_j_total - 1) * block_rows * LANES
    needs_mask = per_batch < capacity                      # static Python bool

    itemsize = jnp.dtype(logits.dtype).itemsize
    cost = pl.CostEstimate(
        flops=14 * total,
        transcendentals=3 * total,
        bytes_accessed=(2 * total * itemsize
                        + total * jnp.dtype(targets.dtype).itemsize
                        + n * n_split * SUBLANES * LANES * 4))

    partial_sums = pl.pallas_call(
        partial(_laplace_sum_kernel, block_rows=block_rows,
                valid_in_last=valid_in_last, needs_mask=needs_mask, clips=clips),
        out_shape=jax.ShapeDtypeStruct((n * n_split * SUBLANES, LANES), jnp.float32),
        grid_spec=pltpu.PrefetchScalarGridSpec(
            num_scalar_prefetch=0,
            grid=(n, n_split, njs),
            in_specs=[
                # one DMA stream carrying both the means and std-logit halves
                pl.BlockSpec((1, 2, block_rows, LANES),
                             lambda i, s, j: (i, 0, s * njs + j, 0)),
                pl.BlockSpec((1, block_rows, LANES),
                             lambda i, s, j: (i, s * njs + j, 0)),
            ],
            out_specs=pl.BlockSpec((SUBLANES, LANES),
                                   lambda i, s, j: (i * n_split + s, 0)),
            scratch_shapes=[pltpu.VMEM((SUBLANES, LANES), jnp.float32)],
        ),
        compiler_params=pltpu.CompilerParams(
            dimension_semantics=("parallel", "parallel", "arbitrary"),
            vmem_limit_bytes=32 * 1024 * 1024),
        cost_estimate=cost,
    )(logits_v, targets_v)

    # mean = sum(root2*delta/std + log(std)) / total + log(sqrt(2))
    return jnp.sum(partial_sums) / jnp.float32(total) + jnp.float32(LOG_ROOT_2)


def laplace_loss_ref(logits, targets, clips=None):
    """Pure-JAX reference mirroring the PyTorch forward."""
    c = targets.shape[1]
    means, std = get_mean_std(logits, c)
    delta = jnp.abs(means.astype(jnp.float32) - targets.astype(jnp.float32))
    if clips is not None:
        delta = jnp.minimum(delta, clips[0])
        std = jnp.maximum(std, clips[1])
    laplace = ROOT_2 * delta / std + jnp.log(ROOT_2 * std)
    return jnp.mean(laplace)


if __name__ == "__main__":
    key = jax.random.PRNGKey(0)
    k1, k2 = jax.random.split(key)

    N, C, H, W = 2, 4, 16, 16
    # logits carry 2*C channels: first C -> means, last C -> (pre-softplus) std
    logits = jax.random.normal(k1, (N, 2 * C, H, W), dtype=jnp.float32)
    targets = jax.random.normal(k2, (N, C, H, W), dtype=jnp.float32)
    clips = (1.0, 0.1)

    loss_fn = jax.jit(partial(laplace_loss, clips=clips))
    loss = jax.block_until_ready(loss_fn(logits, targets))

    ref = jax.block_until_ready(laplace_loss_ref(logits, targets, clips=clips))
    assert jnp.allclose(loss, ref, rtol=1e-5, atol=1e-5), (loss, ref)

    print("KERNEL_OK")
</pallas_src>

<mosaic_0001>
module attributes {stable_mosaic.version = 11 : i64} {
  func.func @_laplace_sum_kernel(%arg0: i32, %arg1: i32, %arg2: i32, %arg3: memref<1x2x8x128xf32, #tpu.memory_space<vmem>>, %arg4: memref<1x8x128xf32, #tpu.memory_space<vmem>>, %arg5: memref<8x128xf32, #tpu.memory_space<vmem>>, %arg6: memref<8x128xf32, #tpu.memory_space<vmem>>) attributes {dimension_semantics = [#tpu.dimension_semantics<parallel>, #tpu.dimension_semantics<parallel>, #tpu.dimension_semantics<arbitrary>], iteration_bounds = array<i64: 2, 1, 1>, scalar_prefetch = 0 : i64, scratch_operands = 1 : i64, tpu.core_type = #tpu.core_type<tc>, window_params = [{transform_indices = @transform_0, window_bounds = array<i64: 1, 2, 8, 128>}, {transform_indices = @transform_1, window_bounds = array<i64: 1, 8, 128>}, {transform_indices = @transform_2, window_bounds = array<i64: 8, 128>}]} {
    %c0_i32 = arith.constant 0 : i32
    %0 = arith.cmpi eq, %arg2, %c0_i32 : i32
    %1 = arith.extui %0 : i1 to i32
    %c0_i32_0 = arith.constant 0 : i32
    %2 = arith.cmpi ne, %1, %c0_i32_0 : i32
    scf.if %2 {
      %cst_23 = arith.constant 0.000000e+00 : f32
      %40 = vector.broadcast %cst_23 : f32 to vector<8x128xf32>
      %c0_24 = arith.constant 0 : index
      %c0_25 = arith.constant 0 : index
      %41 = vector.load %arg6[%c0_24, %c0_25] : memref<8x128xf32, #tpu.memory_space<vmem>>, vector<8x128xf32>
      tpu.vector_store %arg6[%c0_24, %c0_25], %40 {strides = array<i32>} : memref<8x128xf32, #tpu.memory_space<vmem>>, vector<8x128xf32>,
    } else {
    }
    %c0 = arith.constant 0 : index
    %c0_1 = arith.constant 0 : index
    %c0_2 = arith.constant 0 : index
    %c0_3 = arith.constant 0 : index
    %3 = vector.load %arg3[%c0, %c0_1, %c0_2, %c0_3] : memref<1x2x8x128xf32, #tpu.memory_space<vmem>>, vector<1x1x8x128xf32>
    %4 = vector.shape_cast %3 : vector<1x1x8x128xf32> to vector<8x128xf32>
    %c0_4 = arith.constant 0 : index
    %c1 = arith.constant 1 : index
    %c0_5 = arith.constant 0 : index
    %c0_6 = arith.constant 0 : index
    %5 = vector.load %arg3[%c0_4, %c1, %c0_5, %c0_6] : memref<1x2x8x128xf32, #tpu.memory_space<vmem>>, vector<1x1x8x128xf32>
    %6 = vector.shape_cast %5 : vector<1x1x8x128xf32> to vector<8x128xf32>
    %c0_7 = arith.constant 0 : index
    %c0_8 = arith.constant 0 : index
    %c0_9 = arith.constant 0 : index
    %7 = vector.load %arg4[%c0_7, %c0_8, %c0_9] : memref<1x8x128xf32, #tpu.memory_space<vmem>>, vector<1x8x128xf32>
    %8 = vector.shape_cast %7 : vector<1x8x128xf32> to vector<8x128xf32>
    %cst = arith.constant 0.000000e+00 : f32
    %9 = vector.broadcast %cst : f32 to vector<8x128xf32>
    %10 = arith.maximumf %6, %9 : vector<8x128xf32>
    %11 = math.absf %6 : vector<8x128xf32>
    %cst_10 = arith.constant 0.000000e+00 : f32
    %12 = vector.broadcast %cst_10 : f32 to vector<8x128xf32>
    %13 = arith.subf %12, %11 : vector<8x128xf32>
    %14 = math.exp %13 : vector<8x128xf32>
    %cst_11 = arith.constant 1.000000e+00 : f32
    %15 = vector.broadcast %cst_11 : f32 to vector<8x128xf32>
    %16 = arith.addf %15, %14 : vector<8x128xf32>
    %17 = math.log %16 : vector<8x128xf32>
    %18 = arith.addf %10, %17 : vector<8x128xf32>
    %cst_12 = arith.constant 1.000000e-03 : f32
    %19 = vector.broadcast %cst_12 : f32 to vector<8x128xf32>
    %20 = arith.addf %18, %19 : vector<8x128xf32>
    %21 = arith.subf %4, %8 : vector<8x128xf32>
    %22 = math.absf %21 : vector<8x128xf32>
    %cst_13 = arith.constant 1.000000e+00 : f32
    %23 = vector.broadcast %cst_13 : f32 to vector<8x128xf32>
    %24 = arith.minimumf %22, %23 : vector<8x128xf32>
    %cst_14 = arith.constant 1.000000e-01 : f32
    %25 = vector.broadcast %cst_14 : f32 to vector<8x128xf32>
    %26 = arith.maximumf %20, %25 : vector<8x128xf32>
    %cst_15 = arith.constant 1.41421354 : f32
    %27 = vector.broadcast %cst_15 : f32 to vector<8x128xf32>
    %28 = arith.mulf %27, %24 : vector<8x128xf32>
    %29 = arith.divf %28, %26 : vector<8x128xf32>
    %30 = math.log %26 : vector<8x128xf32>
    %31 = arith.addf %29, %30 : vector<8x128xf32>
    %c0_16 = arith.constant 0 : index
    %c0_17 = arith.constant 0 : index
    %32 = vector.load %arg6[%c0_16, %c0_17] : memref<8x128xf32, #tpu.memory_space<vmem>>, vector<8x128xf32>
    %33 = vector.shape_cast %31 : vector<8x128xf32> to vector<1x8x128xf32>
    %cst_18 = arith.constant dense<0.000000e+00> : vector<8x128xf32>
    %34 = vector.multi_reduction <add>, %33, %cst_18 [0] : vector<1x8x128xf32> to vector<8x128xf32>
    %35 = arith.addf %32, %34 : vector<8x128xf32>
    %c0_19 = arith.constant 0 : index
    %c0_20 = arith.constant 0 : index
    %36 = vector.load %arg6[%c0_19, %c0_20] : memref<8x128xf32, #tpu.memory_space<vmem>>, vector<8x128xf32>
    tpu.vector_store %arg6[%c0_19, %c0_20], %35 {strides = array<i32>} : memref<8x128xf32, #tpu.memory_space<vmem>>, vector<8x128xf32>,
    %c0_i32_21 = arith.constant 0 : i32
    %37 = arith.cmpi eq, %arg2, %c0_i32_21 : i32
    %38 = arith.extui %37 : i1 to i32
    %c0_i32_22 = arith.constant 0 : i32
    %39 = arith.cmpi ne, %38, %c0_i32_22 : i32
    scf.if %39 {
      %c0_23 = arith.constant 0 : index
      %c0_24 = arith.constant 0 : index
      %40 = vector.load %arg6[%c0_23, %c0_24] : memref<8x128xf32, #tpu.memory_space<vmem>>, vector<8x128xf32>
      %c0_25 = arith.constant 0 : index
      %c0_26 = arith.constant 0 : index
      %41 = vector.load %arg5[%c0_25, %c0_26] : memref<8x128xf32, #tpu.memory_space<vmem>>, vector<8x128xf32>
      tpu.vector_store %arg5[%c0_25, %c0_26], %40 {strides = array<i32>} : memref<8x128xf32, #tpu.memory_space<vmem>>, vector<8x128xf32>,
    } else {
    }
    return
  }
  func.func @transform_0(%arg0: i32, %arg1: i32, %arg2: i32) -> (i32, i32, i32, i32) {
    %c1_i32 = arith.constant 1 : i32
    %0 = arith.muli %arg1, %c1_i32 : i32
    %1 = arith.addi %0, %arg2 : i32
    %c0_i32 = arith.constant 0 : i32
    %c0_i32_0 = arith.constant 0 : i32
    %c0_i32_1 = arith.constant 0 : i32
    return %arg0, %c0_i32, %1, %c0_i32_0 : i32, i32, i32, i32
  }
  func.func @transform_1(%arg0: i32, %arg1: i32, %arg2: i32) -> (i32, i32, i32) {
    %c1_i32 = arith.constant 1 : i32
    %0 = arith.muli %arg1, %c1_i32 : i32
    %1 = arith.addi %0, %arg2 : i32
    %c0_i32 = arith.constant 0 : i32
    %c0_i32_0 = arith.constant 0 : i32
    return %arg0, %1, %c0_i32 : i32, i32, i32
  }
  func.func @transform_2(%arg0: i32, %arg1: i32, %arg2: i32) -> (i32, i32) {
    %c1_i32 = arith.constant 1 : i32
    %0 = arith.muli %arg0, %c1_i32 : i32
    %1 = arith.addi %0, %arg1 : i32
    %c0_i32 = arith.constant 0 : i32
    %c0_i32_0 = arith.constant 0 : i32
    return %1, %c0_i32 : i32, i32
  }
}

</mosaic_0001>

<bundles_post_ra>
// kernel: laplace_loss.1
= control target key start
LH: loop header
LB: loop body
LE: loop exit
PB: predicated region body
PF: predicated region fallthrough
CT: control target
= control target key end

     0   :  { %s430_s9 = smov 0   ;;  %s432_s10 = smov 0   ;;  %s470_s0 = inlined_call_operand.vmem [shape: f32[2,2,8,128], index: 0, kind: input, shape index: {}]   ;;  %s471_s1 = inlined_call_operand.vmem [shape: f32[2,8,128], index: 1, kind: input, shape index: {}]   ;;  %s472_s2 = inlined_call_operand.vmem [shape: f32[16,128], index: 2, kind: output, shape index: {}]  }
   0x1   :  { %s434_s11 = smov 0  }
   0x2 LB: > { %s31_s12 = sadd.s32 1, %s409_s10  ;;  %p350_p0 = scmp.ge.s32.totalorder %s413_s11, 1  ;;  %s413_s11 = sphi %s434_s11, %s12_s11   ;;  %s409_s10 = sphi %s432_s10, %s474_s10   ;;  %s405_s9 = sphi %s430_s9, %s473_s9  }
   0x3   : > { %p33_p1 = scmp.ge.s32.totalorder %s31_s12, 2  ;;  %p160_p2 = scmp.lt.s32.totalorder %s413_s11, 3 }
   0x5   : > { %s476_s12 = smov (%p33_p1, %s31_s12), 0  ;;  %p161_p3 = pnand %p350_p0, %p160_p2 }
   0x6   : > { %p195_p4 = scmp.lt.s32.totalorder (!%p161_p3), %s405_s9, 1 }
   0x7   : > { %164 = sbr.rel (%p161_p3) target bundleno = 73 (0x49), region = 28 }
   0xe   : > { %s478_s9 = smov (!%p195_p4, %s405_s9), 1 }
   0xf   : > { %s358_s13 = sshll.u32 %s478_s9, 4  ;;  %s353_s17 = sshll.u32 %s478_s9, 3 }
  0x10   : > { %s202_s16 = scalar_lea.vmem %s470_s0, %s358_s13  ;;  %s211_s20 = scalar_lea.vmem %s471_s1, %s353_s17 }
  0x11   : > { %v355_v0 = vld [vmem:[%s202_s16 + $0x8] sm:$0xff]  ;;  %v224_v8 = vld [vmem:[%s202_s16] sm:$0xff]  ;;  %s217_s23 = scalar_lea.vmem %s472_s2, %s353_s17 }
  0x12   : > { %v229_v1 = vand.u32 2147483647, %v355_v0  ;;  %v228_v6 = vmax.f32 %v355_v0, 0.0  ;;  %v227_v9 = vld [vmem:[%s211_s20] sm:$0xff] }
  0x13   : > { %v238_v12 = vsub.f32 %v224_v8, %v227_v9 }
  0x14   : > { %v230_v2 = vsub.f32 0.0, %v229_v1 }
  0x15   : > { %v239_v15 = vand.u32 2147483647, %v238_v12 }
  0x16   : > { %v231_v3 = vmul.f32 1.442695, %v230_v2 }
  0x17   : > { %v240_v16 = vmin.f32 %v239_v15, 1.0 }
  0x18   : > { %383 = vpow2.f32 %v231_v3 }
  0x19   : > { %v242_v17 = vmul.f32 1.4142135, %v240_v16 }
  0x22   : > { %v384_v4 = vpop.eup %383 }
  0x23   : > { %v233_v5 = vadd.f32 1.0, %v384_v4 }
  0x25   : > { %385 = vlog2.f32 %v233_v5 }
  0x2f   : > { %v386_v7 = vpop.eup %385 }
  0x30   : > { %v235_v10 = vmul.f32 0.6931472, %v386_v7 }
  0x32   : > { %v236_v11 = vadd.f32 %v235_v10, %v228_v6 }
  0x34   : > { %v237_v13 = vadd.f32 0.001, %v236_v11 }
  0x36   : > { %v241_v14 = vmax.f32 %v237_v13, 0.1 }
  0x38   : > { %387 = vrcp.f32 %v241_v14 }
  0x39   : > { %389 = vlog2.f32 %v241_v14 }
  0x42   : > { %v388_v18 = vpop.eup %387 }
  0x43   : > { %v390_v19 = vpop.eup %389  ;;  %v244_v20 = vmul.f32 %v388_v18, %v242_v17 }
  0x44   : > { %v246_v21 = vmul.f32 0.6931472, %v390_v19 }
  0x46   : > { %v247_v22 = vadd.f32 %v246_v21, %v244_v20 }
  0x48   : > { %256 = vst [vmem:[%s217_s23] sm:$0xff] %v247_v22 }
  0x49 PF: > { %s12_s11 = sadd.s32 1, %s413_s11   ;;  %s473_s9 = smov %s409_s10 }
  0x4a   : > { %p9_p5 = scmp.ge.s32.totalorder %s12_s11, 4   ;;  %s474_s10 = smov %s476_s12 }
  0x4c   :  { %11 = sbr.rel (!%p9_p5) target bundleno = 2 (0x2), region = 70 }

</bundles_post_ra>
